<compile_context>
chip_gen: v7x
topology: tpu7x:2x2x1
jax: 0.10.0
libtpu: 0.0.40
codegen_flags: <defaults>
</compile_context>

<pallas_src>
import functools

import numpy as np
import jax
import jax.numpy as jnp
from jax.experimental import pallas as pl
from jax.experimental.pallas import tpu as pltpu

T_SHIFT, T_REDUCE, T_SKIP = 0, 1, 2


# ----------------------------- Pallas kernels ------------------------------

def _linear_kernel(x_ref, w_ref, b_ref, o_ref):
    acc = jnp.dot(x_ref[...], w_ref[...], preferred_element_type=jnp.float32)
    o_ref[...] = (acc + b_ref[...]).astype(o_ref.dtype)


def pallas_linear(x, w, b):
    """y = x @ w + b. Whole-array blocks (shapes here are tiny)."""
    M, K = x.shape
    _, N = w.shape
    return pl.pallas_call(
        _linear_kernel,
        out_shape=jax.ShapeDtypeStruct((M, N), jnp.float32),
        grid=(1,),
        in_specs=[
            pl.BlockSpec((M, K), lambda i: (0, 0)),
            pl.BlockSpec((K, N), lambda i: (0, 0)),
            pl.BlockSpec((1, N), lambda i: (0, 0)),
        ],
        out_specs=pl.BlockSpec((M, N), lambda i: (0, 0)),
    )(x, w, b.reshape(1, N))


def _mlp_kernel(x_ref, w0_ref, b0_ref, w1_ref, b1_ref, o_ref):
    # Fused: relu(x @ w0 + b0) @ w1 + b1 — one launch instead of two.
    h = jnp.dot(x_ref[...], w0_ref[...], preferred_element_type=jnp.float32)
    h = jnp.maximum(h + b0_ref[...], 0.0)
    o = jnp.dot(h, w1_ref[...], preferred_element_type=jnp.float32)
    o_ref[...] = (o + b1_ref[...]).astype(o_ref.dtype)


def pallas_mlp(x, w0, b0, w1, b1):
    M, K = x.shape
    H = w0.shape[1]
    N = w1.shape[1]
    return pl.pallas_call(
        _mlp_kernel,
        out_shape=jax.ShapeDtypeStruct((M, N), jnp.float32),
        grid=(1,),
        in_specs=[
            pl.BlockSpec((M, K), lambda i: (0, 0)),
            pl.BlockSpec((K, H), lambda i: (0, 0)),
            pl.BlockSpec((1, H), lambda i: (0, 0)),
            pl.BlockSpec((H, N), lambda i: (0, 0)),
            pl.BlockSpec((1, N), lambda i: (0, 0)),
        ],
        out_specs=pl.BlockSpec((M, N), lambda i: (0, 0)),
    )(x, w0, b0.reshape(1, H), w1, b1.reshape(1, N))


def _lms_kernel(trans_ref, buf_ref, o_ref, stack_ref, sp_ref, bp_ref,
                *, L, stack_max):
    """One grid step = one (batch element, time step) of the stack machine.

    trans_ref : SMEM [B, T] int32 (scalar-prefetched transitions)
    buf_ref   : VMEM [L+1, D, D] lifted items in pop order (row L is zeros pad)
    o_ref     : VMEM [D, D] final stack top for this batch element
    stack_ref : VMEM [stack_max, D, D] the stack (persists across time steps)
    sp_ref    : SMEM [1] stack pointer     bp_ref : SMEM [1] buffer pointer
    """
    b = pl.program_id(0)
    t = pl.program_id(1)

    @pl.when(t == 0)
    def _init():
        # PyTorch: stacks = [zeros, zeros]; buf pop pointer starts at 0.
        stack_ref[...] = jnp.zeros_like(stack_ref)
        sp_ref[0] = jnp.int32(2)
        bp_ref[0] = jnp.int32(0)

    tr = trans_ref[b, t]

    @pl.when(tr == T_SHIFT)
    def _shift():
        bp = bp_ref[0]
        sp = sp_ref[0]
        # Buffer row L is always zeros -> matches popping the `zeros` padding.
        stack_ref[jnp.minimum(sp, stack_max - 1)] = buf_ref[jnp.minimum(bp, L)]
        bp_ref[0] = bp + 1
        sp_ref[0] = sp + 1

    @pl.when(tr == T_REDUCE)
    def _reduce():
        sp = sp_ref[0]
        right = stack_ref[jnp.maximum(sp - 1, 0)]
        left = stack_ref[jnp.maximum(sp - 2, 0)]
        # TODO(synk): exact LMS composition fn (composition_args.composition) is
        # not given in the snippet; using the canonical lifted matrix-space
        # matrix product left @ right.
        stack_ref[jnp.maximum(sp - 2, 0)] = jnp.dot(
            left, right, preferred_element_type=jnp.float32)
        sp_ref[0] = sp - 1

    # T_SKIP: noop (padding)

    @pl.when(t == pl.num_programs(1) - 1)
    def _final():
        o_ref[...] = stack_ref[jnp.maximum(sp_ref[0] - 1, 0)]  # stack[-1]


def pallas_lms_run(transitions, buf, *, B, L, D):
    """Fused LMS.run: whole shift/reduce machine in one pallas_call."""
    T = transitions.shape[1]
    stack_max = L + 2  # [zeros, zeros] + at most L shifted items
    kernel = functools.partial(_lms_kernel, L=L, stack_max=stack_max)
    return pl.pallas_call(
        kernel,
        out_shape=jax.ShapeDtypeStruct((B, D, D), jnp.float32),
        grid_spec=pltpu.PrefetchScalarGridSpec(
            num_scalar_prefetch=1,          # transitions -> SMEM
            grid=(B, T),
            in_specs=[
                pl.BlockSpec((None, L + 1, D, D),
                             lambda b, t, trans: (b, 0, 0, 0)),
            ],
            out_specs=pl.BlockSpec((None, D, D),
                                   lambda b, t, trans: (b, 0, 0)),
            scratch_shapes=[
                pltpu.VMEM((stack_max, D, D), jnp.float32),
                pltpu.SMEM((1,), jnp.int32),   # stack pointer
                pltpu.SMEM((1,), jnp.int32),   # buffer pointer
            ],
        ),
        compiler_params=pltpu.CompilerParams(
            dimension_semantics=("parallel", "arbitrary")),
    )(transitions, buf)


# ------------------------------ model forward ------------------------------

@jax.jit
def base_model_forward(params, tokens, transitions):
    emb = params["embedding"]
    lift_w = params["lift_w"]
    DD = lift_w.shape[1]
    D = int(round(DD ** 0.5))
    B, L = tokens.shape

    # Embed (gather stays in XLA — no Pallas win at this size).
    embeds = jnp.take(emb, tokens.reshape(-1), axis=0)           # [B*L, E]

    # reshape_input / encode / reshape_context: identity context.
    # F.dropout (eval mode): identity.

    # Lift: Linear(input_dim -> D*D), lane-dense [B*L, 256] output.
    lifted = pallas_linear(embeds, lift_w, params["lift_b"])     # [B*L, DD]

    # Buffer in pop order: buf[b, j] = lifted token j if j < n_tokens[b] else 0,
    # plus one always-zero row (index L) that mirrors popping the `zeros`
    # element once the real tokens are exhausted.
    n_tokens = jnp.sum((tokens != 0).astype(jnp.int32), axis=1)  # [B]
    lifted_b = lifted.reshape(B, L, D, D)
    pos = jnp.arange(L, dtype=jnp.int32)
    mask = (pos[None, :] < n_tokens[:, None])[:, :, None, None]
    buf = jnp.where(mask, lifted_b, 0.0)
    buf = jnp.concatenate([buf, jnp.zeros((B, 1, D, D), jnp.float32)], axis=1)

    # Fused shift/reduce stack machine (single Pallas kernel over all steps).
    h = pallas_lms_run(transitions, buf, B=B, L=L, D=D)          # [B, D, D]

    # wrap_sentence / build_features (use_sentence_pair=False): identity.
    features = h.reshape(B, DD)                                  # [B, DD]

    # MLP (num_mlp_layers=1, mlp_ln=False, eval-mode dropout): fused kernel.
    return pallas_mlp(features, params["mlp_w0"], params["mlp_b0"],
                      params["mlp_w1"], params["mlp_b1"])        # [B, classes]


# ----------------------------- numpy reference ------------------------------

def reference_forward(params, tokens, transitions):
    """Pure numpy mirror of the PyTorch BaseModel/LMS forward (verification)."""
    emb = np.asarray(params["embedding"])
    lift_w = np.asarray(params["lift_w"]); lift_b = np.asarray(params["lift_b"])
    w0 = np.asarray(params["mlp_w0"]); b0 = np.asarray(params["mlp_b0"])
    w1 = np.asarray(params["mlp_w1"]); b1 = np.asarray(params["mlp_b1"])
    DD = lift_w.shape[1]
    D = int(round(DD ** 0.5))
    B, L = tokens.shape
    lifted = (emb[tokens.reshape(-1)] @ lift_w + lift_b).reshape(B, L, D, D)
    n_tok = (tokens != 0).sum(axis=1)
    zeros = np.zeros((D, D), np.float32)
    hs = []
    for b in range(B):
        stack = [zeros, zeros]
        j = 0
        for t in range(transitions.shape[1]):
            tr = transitions[b, t]
            if tr == T_SHIFT:
                stack.append(lifted[b, j] if j < n_tok[b] else zeros)
                j += 1
            elif tr == T_REDUCE:
                right = stack.pop() if stack else zeros
                left = stack.pop() if stack else zeros
                stack.append(left @ right)
        hs.append(stack[-1].reshape(DD))
    h = np.stack(hs).astype(np.float32)
    hid = np.maximum(h @ w0 + b0, 0.0)
    return hid @ w1 + b1


# --------------------------------- driver ----------------------------------

def make_params(key, vocab_size=50, word_embedding_dim=32, model_dim=16,
                mlp_dim=64, num_classes=4):
    DD = model_dim * model_dim
    k0, k1, k2, k3 = jax.random.split(key, 4)
    return {
        "embedding": 0.25 * jax.random.normal(
            k0, (vocab_size, word_embedding_dim), dtype=jnp.float32),
        "lift_w": jax.random.normal(k1, (word_embedding_dim, DD),
                                    dtype=jnp.float32) / np.sqrt(word_embedding_dim),
        "lift_b": jnp.zeros((DD,), dtype=jnp.float32),
        "mlp_w0": jax.random.normal(k2, (DD, mlp_dim),
                                    dtype=jnp.float32) / np.sqrt(DD),
        "mlp_b0": jnp.zeros((mlp_dim,), dtype=jnp.float32),
        "mlp_w1": jax.random.normal(k3, (mlp_dim, num_classes),
                                    dtype=jnp.float32) / np.sqrt(mlp_dim),
        "mlp_b1": jnp.zeros((num_classes,), dtype=jnp.float32),
    }


if __name__ == "__main__":
    key = jax.random.PRNGKey(0)
    params = make_params(key)

    # batch=2, seq=8; example 1 has 6 real tokens + 2 zero-padding tokens.
    tokens_np = np.array(
        [[3, 7, 12, 5, 9, 22, 4, 8],
         [11, 2, 6, 14, 19, 3, 0, 0]], dtype=np.int32)

    S, R, K = T_SHIFT, T_REDUCE, T_SKIP
    # left-branching parses; example 1 is left-padded with SKIPs.
    transitions_np = np.array(
        [[S, S, R, S, R, S, R, S, R, S, R, S, R, S, R],   # 8 tokens
         [K, K, K, K, S, S, R, S, R, S, R, S, R, S, R]],  # 6 tokens
        dtype=np.int32)

    out = base_model_forward(params, jnp.asarray(tokens_np),
                             jnp.asarray(transitions_np))
    out = jax.block_until_ready(out)

    assert out.shape == (2, 4) and out.dtype == jnp.float32
    assert bool(jnp.all(jnp.isfinite(out)))

    ref = reference_forward(params, tokens_np, transitions_np)
    err = float(np.max(np.abs(np.asarray(out) - ref)))
    tol = 1e-4 + 1e-2 * float(np.max(np.abs(ref)))
    assert err <= tol, f"mismatch vs reference: max|err|={err} > tol={tol}"

    print("KERNEL_OK")
</pallas_src>

<mosaic_0001>
module attributes {stable_mosaic.version = 11 : i64} {
  func.func @_linear_kernel(%arg0: i32, %arg1: memref<16x32xf32, #tpu.memory_space<vmem>>, %arg2: memref<32x256xf32, #tpu.memory_space<vmem>>, %arg3: memref<1x256xf32, #tpu.memory_space<vmem>>, %arg4: memref<16x256xf32, #tpu.memory_space<vmem>>) attributes {dimension_semantics = [#tpu.dimension_semantics<arbitrary>], iteration_bounds = array<i64: 1>, scalar_prefetch = 0 : i64, scratch_operands = 0 : i64, tpu.core_type = #tpu.core_type<tc>, window_params = [{pipeline_mode = #tpu.pipeline_mode<synchronous>, transform_indices = @transform_0, window_bounds = array<i64: 16, 32>}, {pipeline_mode = #tpu.pipeline_mode<synchronous>, transform_indices = @transform_1, window_bounds = array<i64: 32, 256>}, {pipeline_mode = #tpu.pipeline_mode<synchronous>, transform_indices = @transform_2, window_bounds = array<i64: 1, 256>}, {pipeline_mode = #tpu.pipeline_mode<synchronous>, transform_indices = @transform_3, window_bounds = array<i64: 16, 256>}]} {
    %c0 = arith.constant 0 : index
    %c0_0 = arith.constant 0 : index
    %0 = vector.load %arg1[%c0, %c0_0] : memref<16x32xf32, #tpu.memory_space<vmem>>, vector<16x32xf32>
    %c0_1 = arith.constant 0 : index
    %c0_2 = arith.constant 0 : index
    %1 = vector.load %arg2[%c0_1, %c0_2] : memref<32x256xf32, #tpu.memory_space<vmem>>, vector<32x256xf32>
    %cst = arith.constant dense<0.000000e+00> : vector<16x256xf32>
    %2 = tpu.matmul %0, %1, %cst {dimension_numbers = #tpu.dot_dimension_numbers<[1], [0], [0], [1], [0, 0, 1, 1], [], []>} : vector<16x32xf32>, vector<32x256xf32>, vector<16x256xf32> -> vector<16x256xf32>
    %c0_3 = arith.constant 0 : index
    %c0_4 = arith.constant 0 : index
    %3 = vector.load %arg3[%c0_3, %c0_4] : memref<1x256xf32, #tpu.memory_space<vmem>>, vector<1x256xf32>
    %4 = vector.broadcast %3 : vector<1x256xf32> to vector<16x256xf32>
    %5 = arith.addf %2, %4 : vector<16x256xf32>
    %c0_5 = arith.constant 0 : index
    %c0_6 = arith.constant 0 : index
    %6 = vector.load %arg4[%c0_5, %c0_6] : memref<16x256xf32, #tpu.memory_space<vmem>>, vector<16x256xf32>
    tpu.vector_store %arg4[%c0_5, %c0_6], %5 {strides = array<i32>} : memref<16x256xf32, #tpu.memory_space<vmem>>, vector<16x256xf32>,
    return
  }
  func.func @transform_0(%arg0: i32) -> (i32, i32) {
    %c0_i32 = arith.constant 0 : i32
    %c0_i32_0 = arith.constant 0 : i32
    %c0_i32_1 = arith.constant 0 : i32
    return %c0_i32, %c0_i32_0 : i32, i32
  }
  func.func @transform_1(%arg0: i32) -> (i32, i32) {
    %c0_i32 = arith.constant 0 : i32
    %c0_i32_0 = arith.constant 0 : i32
    %c0_i32_1 = arith.constant 0 : i32
    return %c0_i32, %c0_i32_0 : i32, i32
  }
  func.func @transform_2(%arg0: i32) -> (i32, i32) {
    %c0_i32 = arith.constant 0 : i32
    %c0_i32_0 = arith.constant 0 : i32
    %c0_i32_1 = arith.constant 0 : i32
    return %c0_i32, %c0_i32_0 : i32, i32
  }
  func.func @transform_3(%arg0: i32) -> (i32, i32) {
    %c0_i32 = arith.constant 0 : i32
    %c0_i32_0 = arith.constant 0 : i32
    %c0_i32_1 = arith.constant 0 : i32
    return %c0_i32, %c0_i32_0 : i32, i32
  }
}

module attributes {stable_mosaic.version = 11 : i64} {
  func.func @_lms_kernel(%arg0: i32, %arg1: i32, %arg2: memref<2x15xi32, #tpu.memory_space<smem>>, %arg3: memref<1x9x16x16xf32, #tpu.memory_space<vmem>>, %arg4: memref<1x16x16xf32, #tpu.memory_space<vmem>>, %arg5: memref<10x16x16xf32, #tpu.memory_space<vmem>>, %arg6: memref<1xi32, #tpu.memory_space<smem>>, %arg7: memref<1xi32, #tpu.memory_space<smem>>) attributes {dimension_semantics = [#tpu.dimension_semantics<parallel>, #tpu.dimension_semantics<arbitrary>], iteration_bounds = array<i64: 2, 15>, scalar_prefetch = 1 : i64, scratch_operands = 3 : i64, tpu.core_type = #tpu.core_type<tc>, window_params = [{transform_indices = @transform_0, window_bounds = array<i64: 1, 9, 16, 16>}, {transform_indices = @transform_1, window_bounds = array<i64: 1, 16, 16>}]} {
    %c0_i32 = arith.constant 0 : i32
    %0 = arith.cmpi eq, %arg1, %c0_i32 : i32
    %1 = arith.extui %0 : i1 to i32
    %c0_i32_0 = arith.constant 0 : i32
    %2 = arith.cmpi ne, %1, %c0_i32_0 : i32
    scf.if %2 {
      %cst = arith.constant 0.000000e+00 : f32
      %15 = vector.broadcast %cst : f32 to vector<10x16x16xf32>
      %c0 = arith.constant 0 : index
      %c0_5 = arith.constant 0 : index
      %c0_6 = arith.constant 0 : index
      %16 = vector.load %arg5[%c0, %c0_5, %c0_6] : memref<10x16x16xf32, #tpu.memory_space<vmem>>, vector<10x16x16xf32>
      tpu.vector_store %arg5[%c0, %c0_5, %c0_6], %15 {strides = array<i32>} : memref<10x16x16xf32, #tpu.memory_space<vmem>>, vector<10x16x16xf32>,
      %c2_i32 = arith.constant 2 : i32
      %c0_7 = arith.constant 0 : index
      %17 = memref.load %arg6[%c0_7] : memref<1xi32, #tpu.memory_space<smem>>
      memref.store %c2_i32, %arg6[%c0_7] : memref<1xi32, #tpu.memory_space<smem>>
      %c0_i32_8 = arith.constant 0 : i32
      %c0_9 = arith.constant 0 : index
      %18 = memref.load %arg7[%c0_9] : memref<1xi32, #tpu.memory_space<smem>>
      memref.store %c0_i32_8, %arg7[%c0_9] : memref<1xi32, #tpu.memory_space<smem>>
    } else {
    }
    %3 = arith.index_cast %arg0 : i32 to index
    %4 = arith.index_cast %arg1 : i32 to index
    %5 = memref.load %arg2[%3, %4] : memref<2x15xi32, #tpu.memory_space<smem>>
    %c0_i32_1 = arith.constant 0 : i32
    %6 = arith.cmpi eq, %5, %c0_i32_1 : i32
    %7 = arith.extui %6 : i1 to i32
    %c0_i32_2 = arith.constant 0 : i32
    %8 = arith.cmpi ne, %7, %c0_i32_2 : i32
    scf.if %8 {
      %c0 = arith.constant 0 : index
      %15 = memref.load %arg7[%c0] : memref<1xi32, #tpu.memory_space<smem>>
      %c0_5 = arith.constant 0 : index
      %16 = memref.load %arg6[%c0_5] : memref<1xi32, #tpu.memory_space<smem>>
      %c8_i32 = arith.constant 8 : i32
      %17 = arith.minsi %15, %c8_i32 : i32
      %c0_6 = arith.constant 0 : index
      %18 = arith.index_cast %17 : i32 to index
      %c0_7 = arith.constant 0 : index
      %c0_8 = arith.constant 0 : index
      %19 = vector.load %arg3[%c0_6, %18, %c0_7, %c0_8] : memref<1x9x16x16xf32, #tpu.memory_space<vmem>>, vector<1x1x16x16xf32>
      %20 = vector.shape_cast %19 : vector<1x1x16x16xf32> to vector<16x16xf32>
      %c9_i32 = arith.constant 9 : i32
      %21 = arith.minsi %16, %c9_i32 : i32
      %22 = arith.index_cast %21 : i32 to index
      %c0_9 = arith.constant 0 : index
      %c0_10 = arith.constant 0 : index
      %23 = vector.load %arg5[%22, %c0_9, %c0_10] : memref<10x16x16xf32, #tpu.memory_space<vmem>>, vector<1x16x16xf32>
      %24 = vector.shape_cast %23 : vector<1x16x16xf32> to vector<16x16xf32>
      %25 = vector.shape_cast %20 : vector<16x16xf32> to vector<1x16x16xf32>
      tpu.vector_store %arg5[%22, %c0_9, %c0_10], %25 {strides = array<i32>} : memref<10x16x16xf32, #tpu.memory_space<vmem>>, vector<1x16x16xf32>,
      %c1_i32_11 = arith.constant 1 : i32
      %26 = arith.addi %15, %c1_i32_11 : i32
      %c0_12 = arith.constant 0 : index
      %27 = memref.load %arg7[%c0_12] : memref<1xi32, #tpu.memory_space<smem>>
      memref.store %26, %arg7[%c0_12] : memref<1xi32, #tpu.memory_space<smem>>
      %c1_i32_13 = arith.constant 1 : i32
      %28 = arith.addi %16, %c1_i32_13 : i32
      %c0_14 = arith.constant 0 : index
      %29 = memref.load %arg6[%c0_14] : memref<1xi32, #tpu.memory_space<smem>>
      memref.store %28, %arg6[%c0_14] : memref<1xi32, #tpu.memory_space<smem>>
    } else {
    }
    %c1_i32 = arith.constant 1 : i32
    %9 = arith.cmpi eq, %5, %c1_i32 : i32
    %10 = arith.extui %9 : i1 to i32
    %c0_i32_3 = arith.constant 0 : i32
    %11 = arith.cmpi ne, %10, %c0_i32_3 : i32
    scf.if %11 {
      %c0 = arith.constant 0 : index
      %15 = memref.load %arg6[%c0] : memref<1xi32, #tpu.memory_space<smem>>
      %c1_i32_5 = arith.constant 1 : i32
      %16 = arith.subi %15, %c1_i32_5 : i32
      %c0_i32_6 = arith.constant 0 : i32
      %17 = arith.maxsi %16, %c0_i32_6 : i32
      %18 = arith.index_cast %17 : i32 to index
      %c0_7 = arith.constant 0 : index
      %c0_8 = arith.constant 0 : index
      %19 = vector.load %arg5[%18, %c0_7, %c0_8] : memref<10x16x16xf32, #tpu.memory_space<vmem>>, vector<1x16x16xf32>
      %20 = vector.shape_cast %19 : vector<1x16x16xf32> to vector<16x16xf32>
      %c2_i32 = arith.constant 2 : i32
      %21 = arith.subi %15, %c2_i32 : i32
      %c0_i32_9 = arith.constant 0 : i32
      %22 = arith.maxsi %21, %c0_i32_9 : i32
      %23 = arith.index_cast %22 : i32 to index
      %c0_10 = arith.constant 0 : index
      %c0_11 = arith.constant 0 : index
      %24 = vector.load %arg5[%23, %c0_10, %c0_11] : memref<10x16x16xf32, #tpu.memory_space<vmem>>, vector<1x16x16xf32>
      %25 = vector.shape_cast %24 : vector<1x16x16xf32> to vector<16x16xf32>
      %cst = arith.constant dense<0.000000e+00> : vector<16x16xf32>
      %26 = tpu.matmul %25, %20, %cst {dimension_numbers = #tpu.dot_dimension_numbers<[1], [0], [0], [1], [0, 0, 1, 1], [], []>} : vector<16x16xf32>, vector<16x16xf32>, vector<16x16xf32> -> vector<16x16xf32>
      %c2_i32_12 = arith.constant 2 : i32
      %27 = arith.subi %15, %c2_i32_12 : i32
      %c0_i32_13 = arith.constant 0 : i32
      %28 = arith.maxsi %27, %c0_i32_13 : i32
      %29 = arith.index_cast %28 : i32 to index
      %c0_14 = arith.constant 0 : index
      %c0_15 = arith.constant 0 : index
      %30 = vector.load %arg5[%29, %c0_14, %c0_15] : memref<10x16x16xf32, #tpu.memory_space<vmem>>, vector<1x16x16xf32>
      %31 = vector.shape_cast %30 : vector<1x16x16xf32> to vector<16x16xf32>
      %32 = vector.shape_cast %26 : vector<16x16xf32> to vector<1x16x16xf32>
      tpu.vector_store %arg5[%29, %c0_14, %c0_15], %32 {strides = array<i32>} : memref<10x16x16xf32, #tpu.memory_space<vmem>>, vector<1x16x16xf32>,
      %c1_i32_16 = arith.constant 1 : i32
      %33 = arith.subi %15, %c1_i32_16 : i32
      %c0_17 = arith.constant 0 : index
      %34 = memref.load %arg6[%c0_17] : memref<1xi32, #tpu.memory_space<smem>>
      memref.store %33, %arg6[%c0_17] : memref<1xi32, #tpu.memory_space<smem>>
    } else {
    }
    %c14_i32 = arith.constant 14 : i32
    %12 = arith.cmpi eq, %arg1, %c14_i32 : i32
    %13 = arith.extui %12 : i1 to i32
    %c0_i32_4 = arith.constant 0 : i32
    %14 = arith.cmpi ne, %13, %c0_i32_4 : i32
    scf.if %14 {
      %c0 = arith.constant 0 : index
      %15 = memref.load %arg6[%c0] : memref<1xi32, #tpu.memory_space<smem>>
      %c1_i32_5 = arith.constant 1 : i32
      %16 = arith.subi %15, %c1_i32_5 : i32
      %c0_i32_6 = arith.constant 0 : i32
      %17 = arith.maxsi %16, %c0_i32_6 : i32
      %18 = arith.index_cast %17 : i32 to index
      %c0_7 = arith.constant 0 : index
      %c0_8 = arith.constant 0 : index
      %19 = vector.load %arg5[%18, %c0_7, %c0_8] : memref<10x16x16xf32, #tpu.memory_space<vmem>>, vector<1x16x16xf32>
      %20 = vector.shape_cast %19 : vector<1x16x16xf32> to vector<16x16xf32>
      %c0_9 = arith.constant 0 : index
      %c0_10 = arith.constant 0 : index
      %c0_11 = arith.constant 0 : index
      %21 = vector.load %arg4[%c0_9, %c0_10, %c0_11] : memref<1x16x16xf32, #tpu.memory_space<vmem>>, vector<1x16x16xf32>
      %22 = vector.shape_cast %21 : vector<1x16x16xf32> to vector<16x16xf32>
      %23 = vector.shape_cast %20 : vector<16x16xf32> to vector<1x16x16xf32>
      tpu.vector_store %arg4[%c0_9, %c0_10, %c0_11], %23 {strides = array<i32>} : memref<1x16x16xf32, #tpu.memory_space<vmem>>, vector<1x16x16xf32>,
    } else {
    }
    return
  }
  func.func @transform_0(%arg0: i32, %arg1: i32, %arg2: memref<2x15xi32, #tpu.memory_space<smem>>) -> (i32, i32, i32, i32) {
    %c0_i32 = arith.constant 0 : i32
    %c0_i32_0 = arith.constant 0 : i32
    %c0_i32_1 = arith.constant 0 : i32
    %c0_i32_2 = arith.constant 0 : i32
    return %arg0, %c0_i32, %c0_i32_0, %c0_i32_1 : i32, i32, i32, i32
  }
  func.func @transform_1(%arg0: i32, %arg1: i32, %arg2: memref<2x15xi32, #tpu.memory_space<smem>>) -> (i32, i32, i32) {
    %c0_i32 = arith.constant 0 : i32
    %c0_i32_0 = arith.constant 0 : i32
    %c0_i32_1 = arith.constant 0 : i32
    return %arg0, %c0_i32, %c0_i32_0 : i32, i32, i32
  }
}

module attributes {stable_mosaic.version = 11 : i64} {
  func.func @_mlp_kernel(%arg0: i32, %arg1: memref<2x256xf32, #tpu.memory_space<vmem>>, %arg2: memref<256x64xf32, #tpu.memory_space<vmem>>, %arg3: memref<1x64xf32, #tpu.memory_space<vmem>>, %arg4: memref<64x4xf32, #tpu.memory_space<vmem>>, %arg5: memref<1x4xf32, #tpu.memory_space<vmem>>, %arg6: memref<2x4xf32, #tpu.memory_space<vmem>>) attributes {dimension_semantics = [#tpu.dimension_semantics<arbitrary>], iteration_bounds = array<i64: 1>, scalar_prefetch = 0 : i64, scratch_operands = 0 : i64, tpu.core_type = #tpu.core_type<tc>, window_params = [{pipeline_mode = #tpu.pipeline_mode<synchronous>, transform_indices = @transform_0, window_bounds = array<i64: 2, 256>}, {pipeline_mode = #tpu.pipeline_mode<synchronous>, transform_indices = @transform_1, window_bounds = array<i64: 256, 64>}, {pipeline_mode = #tpu.pipeline_mode<synchronous>, transform_indices = @transform_2, window_bounds = array<i64: 1, 64>}, {pipeline_mode = #tpu.pipeline_mode<synchronous>, transform_indices = @transform_3, window_bounds = array<i64: 64, 4>}, {pipeline_mode = #tpu.pipeline_mode<synchronous>, transform_indices = @transform_4, window_bounds = array<i64: 1, 4>}, {pipeline_mode = #tpu.pipeline_mode<synchronous>, transform_indices = @transform_5, window_bounds = array<i64: 2, 4>}]} {
    %c0 = arith.constant 0 : index
    %c0_0 = arith.constant 0 : index
    %0 = vector.load %arg1[%c0, %c0_0] : memref<2x256xf32, #tpu.memory_space<vmem>>, vector<2x256xf32>
    %c0_1 = arith.constant 0 : index
    %c0_2 = arith.constant 0 : index
    %1 = vector.load %arg2[%c0_1, %c0_2] : memref<256x64xf32, #tpu.memory_space<vmem>>, vector<256x64xf32>
    %cst = arith.constant dense<0.000000e+00> : vector<2x64xf32>
    %2 = tpu.matmul %0, %1, %cst {dimension_numbers = #tpu.dot_dimension_numbers<[1], [0], [0], [1], [0, 0, 1, 1], [], []>} : vector<2x256xf32>, vector<256x64xf32>, vector<2x64xf32> -> vector<2x64xf32>
    %c0_3 = arith.constant 0 : index
    %c0_4 = arith.constant 0 : index
    %3 = vector.load %arg3[%c0_3, %c0_4] : memref<1x64xf32, #tpu.memory_space<vmem>>, vector<1x64xf32>
    %4 = vector.broadcast %3 : vector<1x64xf32> to vector<2x64xf32>
    %5 = arith.addf %2, %4 : vector<2x64xf32>
    %cst_5 = arith.constant 0.000000e+00 : f32
    %6 = vector.broadcast %cst_5 : f32 to vector<2x64xf32>
    %7 = arith.maximumf %5, %6 : vector<2x64xf32>
    %c0_6 = arith.constant 0 : index
    %c0_7 = arith.constant 0 : index
    %8 = vector.load %arg4[%c0_6, %c0_7] : memref<64x4xf32, #tpu.memory_space<vmem>>, vector<64x4xf32>
    %cst_8 = arith.constant dense<0.000000e+00> : vector<2x4xf32>
    %9 = tpu.matmul %7, %8, %cst_8 {dimension_numbers = #tpu.dot_dimension_numbers<[1], [0], [0], [1], [0, 0, 1, 1], [], []>} : vector<2x64xf32>, vector<64x4xf32>, vector<2x4xf32> -> vector<2x4xf32>
    %c0_9 = arith.constant 0 : index
    %c0_10 = arith.constant 0 : index
    %10 = vector.load %arg5[%c0_9, %c0_10] : memref<1x4xf32, #tpu.memory_space<vmem>>, vector<1x4xf32>
    %11 = vector.broadcast %10 : vector<1x4xf32> to vector<2x4xf32>
    %12 = arith.addf %9, %11 : vector<2x4xf32>
    %c0_11 = arith.constant 0 : index
    %c0_12 = arith.constant 0 : index
    %13 = vector.load %arg6[%c0_11, %c0_12] : memref<2x4xf32, #tpu.memory_space<vmem>>, vector<2x4xf32>
    tpu.vector_store %arg6[%c0_11, %c0_12], %12 {strides = array<i32>} : memref<2x4xf32, #tpu.memory_space<vmem>>, vector<2x4xf32>,
    return
  }
  func.func @transform_0(%arg0: i32) -> (i32, i32) {
    %c0_i32 = arith.constant 0 : i32
    %c0_i32_0 = arith.constant 0 : i32
    %c0_i32_1 = arith.constant 0 : i32
    return %c0_i32, %c0_i32_0 : i32, i32
  }
  func.func @transform_1(%arg0: i32) -> (i32, i32) {
    %c0_i32 = arith.constant 0 : i32
    %c0_i32_0 = arith.constant 0 : i32
    %c0_i32_1 = arith.constant 0 : i32
    return %c0_i32, %c0_i32_0 : i32, i32
  }
  func.func @transform_2(%arg0: i32) -> (i32, i32) {
    %c0_i32 = arith.constant 0 : i32
    %c0_i32_0 = arith.constant 0 : i32
    %c0_i32_1 = arith.constant 0 : i32
    return %c0_i32, %c0_i32_0 : i32, i32
  }
  func.func @transform_3(%arg0: i32) -> (i32, i32) {
    %c0_i32 = arith.constant 0 : i32
    %c0_i32_0 = arith.constant 0 : i32
    %c0_i32_1 = arith.constant 0 : i32
    return %c0_i32, %c0_i32_0 : i32, i32
  }
  func.func @transform_4(%arg0: i32) -> (i32, i32) {
    %c0_i32 = arith.constant 0 : i32
    %c0_i32_0 = arith.constant 0 : i32
    %c0_i32_1 = arith.constant 0 : i32
    return %c0_i32, %c0_i32_0 : i32, i32
  }
  func.func @transform_5(%arg0: i32) -> (i32, i32) {
    %c0_i32 = arith.constant 0 : i32
    %c0_i32_0 = arith.constant 0 : i32
    %c0_i32_1 = arith.constant 0 : i32
    return %c0_i32, %c0_i32_0 : i32, i32
  }
}

</mosaic_0001>

<bundles_post_ra>
// kernel: base_model_forward.3
= control target key start
LH: loop header
LB: loop body
LE: loop exit
PB: predicated region body
PF: predicated region fallthrough
CT: control target
= control target key end

     0   :  { %v143_v3 = vmov 0.0   ;;  %vm36_vm0 = vcmask 261120   ;;  %v26_v15 = vlaneseq  ;;  %s209_s1 = inlined_call_operand.vmem [shape: f32[32,256], index: 1, kind: input, shape index: {}]   ;;  %s210_s0 = inlined_call_operand.vmem [shape: f32[16,32], index: 0, kind: input, shape index: {}]   ;;  %s211_s2 = inlined_call_operand.vmem [shape: f32[1,256], index: 2, kind: input, shape index: {}]   ;;  %s212_s3 = inlined_call_operand.vmem [shape: f32[16,256], index: 3, kind: output, shape index: {}]  }
   0x1   :  { %v17_v0 = vld [vmem:[%s209_s1 + $0x8] sm:$0xff]  ;;  %v19_v1 = vld [vmem:[%s209_s1 + $0x18] sm:$0xff]  ;;  %v16_v2 = vld [vmem:[%s209_s1] sm:$0xff]  ;;  %107 = vmatprep.mubr.f32.mxu0 %v143_v3  ;;  %113 = vmatprep.mubr.f32.mxu1 %v143_v3 }
   0x2   :  { %v130_v4 = vpack.c.bf16 %v19_v1, %v17_v0  ;;  %v18_v5 = vld [vmem:[%s209_s1 + $0x10] sm:$0xff]  ;;  %v21_v6 = vld [vmem:[%s209_s1 + $0x28] sm:$0xff]  ;;  %v23_v7 = vld [vmem:[%s209_s1 + $0x38] sm:$0xff]  ;;  %v27_v16 = vshrl.u32 %v26_v15, 7 }
   0x3   :  { %v132_v8 = vpack.c.bf16 %v18_v5, %v16_v2  ;;  %v134_v9 = vpack.c.bf16 %v23_v7, %v21_v6  ;;  %v20_v10 = vld [vmem:[%s209_s1 + $0x20] sm:$0xff]  ;;  %v22_v11 = vld [vmem:[%s209_s1 + $0x30] sm:$0xff]  ;;  %v15_v14 = vld [vmem:[%s210_s0 + $0x8] sm:$0xff] }
   0x4   :  { %131 = vmatprep.subr.bf16.mxu0 %v130_v4  ;;  %138 = vmatprep.subr.bf16.mxu1 %v130_v4  ;;  %v136_v12 = vpack.c.bf16 %v22_v11, %v20_v10  ;;  %v14_v13 = vld [vmem:[%s210_s0] sm:$0xff]  ;;  %v28_v17 = vsub.s32 0, %v27_v16  ;;  %v32_v19 = vsub.s32 1, %v27_v16 }
   0x5   :  { %133 = vmatpush1.bf16.msra.mxu0 %v132_v8  ;;  %140 = vmatpush1.bf16.msra.mxu1 %v132_v8  ;;  %v24_v18 = vld [vmem:[%s211_s2] sm:$0x3] }
   0x6   :  { %135 = vmatprep.subr.bf16.mxu0 %v134_v9  ;;  %139 = vmatprep.subr.bf16.mxu1 %v134_v9  ;;  %v29_v20 = vrot.slane %v24_v18, %v28_v17  ;;  %v33_v21 = vrot.slane %v24_v18, %v32_v19 }
   0x9   :  { %137 = vmatpush1.bf16.msra.mxu0 %v136_v12  ;;  %141 = vmatpush1.bf16.msra.mxu1 %v136_v12 }
   0xc   :  { %128 = vmatmul.mubr.msk.f32.vlgmr.msra.gmra.mrb[0].mxu0 %vm36_vm0, %v14_v13  ;;  %129 = vmatmul.mubr.msk.f32.vlgmr.msra.gmra.mrb[0].mxu1 %vm36_vm0, %v15_v14 }
  0xdf   :  { %v109_v22 = vpop.f32.mrb[0].mxu0  ;;  %v115_v23 = vpop.f32.mrb[0].mxu1 }
  0xe0   :  { %v110_v24 = vadd.f32 %v109_v22, %v29_v20  ;;  %v116_v25 = vadd.f32 %v115_v23, %v29_v20  ;;  %v111_v26 = vpop.f32.mrb[1].mxu0  ;;  %v117_v27 = vpop.f32.mrb[1].mxu1 }
  0xe1   :  { %v112_v28 = vadd.f32 %v111_v26, %v33_v21  ;;  %v118_v29 = vadd.f32 %v117_v27, %v33_v21 }
  0xe2   :  { %120 = vst [vmem:[%s212_s3] sm:$0xff] %v110_v24  ;;  %122 = vst [vmem:[%s212_s3 + $0x10] sm:$0xff] %v116_v25 }
  0xe3   :  { %121 = vst [vmem:[%s212_s3 + $0x8] sm:$0xff] %v112_v28  ;;  %123 = vst [vmem:[%s212_s3 + $0x18] sm:$0xff] %v118_v29 }

// kernel: base_model_forward.4
= control target key start
LH: loop header
LB: loop body
LE: loop exit
PB: predicated region body
PF: predicated region fallthrough
CT: control target
= control target key end

     0   :  { %s645_s0 = inlined_call_operand.vmem [shape: s32[2,15], index: 0, kind: input, shape index: {}]   ;;  %s646_s1 = inlined_call_operand.vmem [shape: f32[2,9,16,16], index: 1, kind: input, shape index: {}]   ;;  %s647_s2 = inlined_call_operand.vmem [shape: f32[2,16,16], index: 2, kind: output, shape index: {}]  }
   0x1   :  { %s7_s11 = sshll.u32 %s645_s0, 4  ;;  %s8_s11 = int_to_ptr.vmem [resolvable:$true] %s7_s11 }
   0x2   :  { %s480_s12 = scalar_lea.vmem %s8_s11, 32  ;;  %p485_p1 = scmp.lt.s32.totalorder %s8_s11, %s8_s11 }
   0x3   :  { %p481_p0 = scmp.ne.s32.totalorder %s8_s11, %s480_s12  ;;  %p486_p2 = scmp.lt.s32.totalorder %s480_s12, %s480_s12 }
   0x5   :  { %p487_p3 = por %p486_p2, %p485_p1 }
   0x7   :  { %p488_p4 = pnand %p487_p3, %p481_p0 }
   0x9   :  { %491 = shalt.err (!%p488_p4)  }
   0xa   :  { %s534_s13 = smov [#allocation6]  }
   0xb   :  { %10 = dma.vmem_to_smem %s8_s11, 32, %s534_s13, [#allocation5] }
   0xc   :  { %512 = dma.done.wait [#allocation5], 32 }
   0xd   :  { %513 = vsyncadd [#allocation5], 4294967264 }
   0xe   :  { %12 = sfence }
   0xf   :  { %s556_s14 = smov 0   ;;  %s558_s15 = smov 0  }
  0x10   :  { %s560_s16 = smov 0   ;;  %s562_s0 = smov 0  }
  0x11   :  { %s564_s17 = smov 0  }
  0x12 LB: > { %s27_s18 = sadd.s32 1, %s524_s16  ;;  %s30_s19 = sadd.s32 1, %s528_s0  ;;  %s532_s17 = sphi %s564_s17, %s18_s17   ;;  %s528_s0 = sphi %s562_s0, %s651_s0   ;;  %s524_s16 = sphi %s560_s16, %s650_s16   ;;  %s520_s15 = sphi %s558_s15, %s649_s15   ;;  %s516_s14 = sphi %s556_s14, %s648_s14  }
  0x13   : > { %p28_p5 = scmp.ge.s32.totalorder %s27_s18, 15  ;;  %p398_p6 = scmp.ge.s32.totalorder %s532_s17, 1 }
  0x14   : > { %p106_p7 = scmp.lt.s32.totalorder %s532_s17, 31 }
  0x15   : > { %s653_s18 = smov (%p28_p5, %s27_s18), 0  ;;  %s655_s19 = smov (!%p28_p5, %s30_s19), %s528_s0 }
  0x16   : > { %p107_p8 = pnand %p398_p6, %p106_p7  ;;  %p32_p9 = scmp.ge.s32.totalorder %s655_s19, 2 }
  0x17   : > { %p126_p10 = scmp.lt.s32.totalorder (!%p107_p8), %s520_s15, 1  ;;  %p402_p11 = scmp.ne.s32.totalorder (!%p107_p8), %s516_s14, 0 }
  0x18   : > { %s657_s19 = smov (%p32_p9, %s655_s19), 0  ;;  %110 = sbr.rel (%p107_p8) target bundleno = 316 (0x13c), region = 24 }
  0x1f   : > { %s127_s20 = scalar_select %p126_p10, %s520_s15, 1 }
  0x20   : > { %139 = sbr.rel (%p402_p11) target bundleno = 43 (0x2b), region = 28  ;;  %vm140_vm0 = vcmask (!%p402_p11), 130048   ;;  %v535_v0 = vmov (!%p402_p11), 0.0   ;;  %s536_s29 = smov (!%p402_p11), 2  }
  0x21   : > { %s435_s21 = smul.u32 144, %s127_s20  ;;  %s419_s22 = sshll.u32 %s127_s20, 4  ;;  %141 = vst.msk [vmem:[#allocation2] sm:$0xff] (!%p402_p11), %vm140_vm0, %v535_v0  ;;  %142 = vst.msk [vmem:[#allocation2 + $0x8] sm:$0xff] (!%p402_p11), %vm140_vm0, %v535_v0 }
  0x22   : > { %s595_s25 = scalar_lea.vmem %s647_s2, %s419_s22  ;;  %143 = vst.msk [vmem:[#allocation2 + $0x10] sm:$0xff] (!%p402_p11), %vm140_vm0, %v535_v0  ;;  %144 = vst.msk [vmem:[#allocation2 + $0x18] sm:$0xff] (!%p402_p11), %vm140_vm0, %v535_v0  ;;  %162 = sst [smem:[#allocation3]] (!%p402_p11), %s536_s29 }
  0x23   : > { %s600_s28 = scalar_lea.vmem %s646_s1, %s435_s21  ;;  %145 = vst.msk [vmem:[#allocation2 + $0x20] sm:$0xff] (!%p402_p11), %vm140_vm0, %v535_v0  ;;  %146 = vst.msk [vmem:[#allocation2 + $0x28] sm:$0xff] (!%p402_p11), %vm140_vm0, %v535_v0  ;;  %s537_s30 = smov (!%p402_p11), 0  }
  0x24   : > { %147 = vst.msk [vmem:[#allocation2 + $0x30] sm:$0xff] (!%p402_p11), %vm140_vm0, %v535_v0  ;;  %148 = vst.msk [vmem:[#allocation2 + $0x38] sm:$0xff] (!%p402_p11), %vm140_vm0, %v535_v0  ;;  %164 = sst [smem:[#allocation4]] (!%p402_p11), %s537_s30 }
  0x25   : > { %149 = vst.msk [vmem:[#allocation2 + $0x40] sm:$0xff] (!%p402_p11), %vm140_vm0, %v535_v0  ;;  %150 = vst.msk [vmem:[#allocation2 + $0x48] sm:$0xff] (!%p402_p11), %vm140_vm0, %v535_v0 }
  0x26   : > { %151 = vst.msk [vmem:[#allocation2 + $0x50] sm:$0xff] (!%p402_p11), %vm140_vm0, %v535_v0  ;;  %152 = vst.msk [vmem:[#allocation2 + $0x58] sm:$0xff] (!%p402_p11), %vm140_vm0, %v535_v0 }
  0x27   : > { %153 = vst.msk [vmem:[#allocation2 + $0x60] sm:$0xff] %vm140_vm0, %v535_v0  ;;  %154 = vst.msk [vmem:[#allocation2 + $0x68] sm:$0xff] %vm140_vm0, %v535_v0 }
  0x28   : > { %155 = vst.msk [vmem:[#allocation2 + $0x70] sm:$0xff] %vm140_vm0, %v535_v0  ;;  %156 = vst.msk [vmem:[#allocation2 + $0x78] sm:$0xff] %vm140_vm0, %v535_v0 }
  0x29   : > { %157 = vst.msk [vmem:[#allocation2 + $0x80] sm:$0xff] %vm140_vm0, %v535_v0  ;;  %158 = vst.msk [vmem:[#allocation2 + $0x88] sm:$0xff] %vm140_vm0, %v535_v0 }
  0x2a   : > { %159 = vst.msk [vmem:[#allocation2 + $0x90] sm:$0xff] %vm140_vm0, %v535_v0  ;;  %160 = vst.msk [vmem:[#allocation2 + $0x98] sm:$0xff] %vm140_vm0, %v535_v0 }
  0x2b PF: > { %s165_s3 = sshra.s32 %s516_s14, 7  ;;  %s170_s4 = sand.u32 127, %s516_s14 }
  0x2c   : > { %s167_s5 = sadd.s32 %s520_s15, %s165_s3 }
  0x2d   : > { %s403_s6 = sshll.u32 %s167_s5, 7 }
  0x2e   : > { %s171_s7 = sadd.s32 %s403_s6, %s170_s4 }
  0x2f   : > { %s172_s8 = sld [smem:[#allocation6 + %s171_s7]] }
  0x35   : > { %p404_p12 = scmp.ne.s32.totalorder %s172_s8, 0 }
  0x36   : > { %s177_s9 = sld [smem:[#allocation4]] (!%p404_p12)  ;;  %vm189_vm1 = vcmask (!%p404_p12), 130048  }
  0x37   : > { %176 = sbr.rel (%p404_p12) target bundleno = 67 (0x43), region = 32  ;;  %s178_s10 = sld [smem:[#allocation3]] (!%p404_p12) }
  0x3c   : > { %p179_p13 = scmp.lt.s32.totalorder (!%p404_p12), %s177_s9, 8  ;;  %s192_s11 = sadd.s32 (!%p404_p12), 1, %s177_s9 }
  0x3d   : > { %p185_p0 = scmp.lt.s32.totalorder (!%p404_p12), %s178_s10, 9  ;;  %s195_s12 = sadd.s32 (!%p404_p12), 1, %s178_s10 }
  0x3e   : > { %s659_s9 = smov (!%p179_p13, %s177_s9), 8  ;;  %194 = sst [smem:[#allocation4]] %s192_s11 }
  0x3f   : > { %s661_s10 = smov (!%p185_p0, %s178_s10), 9  ;;  %s405_s13 = sshll.u32 %s659_s9, 4 }
  0x40   : > { %s182_s20 = scalar_lea.vmem %s600_s28, %s405_s13  ;;  %s406_s21 = sshll.u32 %s661_s10, 4 }
  0x41   : > { %v183_v1 = vld [vmem:[%s182_s20] sm:$0xff]  ;;  %197 = sst [smem:[#allocation3]] %s195_s12  ;;  %v184_v2 = vld [vmem:[%s182_s20 + $0x8] sm:$0xff]  ;;  %s188_s15 = scalar_lea.vmem [#allocation2], %s406_s21 }
  0x42   : > { %190 = vst.msk [vmem:[%s188_s15] sm:$0xff] %vm189_vm1, %v183_v1  ;;  %191 = vst.msk [vmem:[%s188_s15 + $0x8] sm:$0xff] %vm189_vm1, %v184_v2 }
  0x43 PF: > { %p407_p1 = scmp.ne.s32.totalorder %s172_s8, 1 }
  0x44   : > { %s202_s22 = sld [smem:[#allocation3]] (!%p407_p1)  ;;  %vm217_vm2 = vcmask (!%p407_p1), 130048  }
  0x45   : > { %201 = sbr.rel (%p407_p1) target bundleno = 301 (0x12d), region = 36 }
  0x4a   : > { %s408_s23 = sadd.s32 (!%p407_p1), 4294967295, %s202_s22  ;;  %s410_s24 = sadd.s32 (!%p407_p1), 4294967294, %s202_s22 }
  0x4b   : > { %p204_p2 = scmp.gt.s32.totalorder (!%p407_p1), %s408_s23, 0  ;;  %302 = sst [smem:[#allocation3]] (!%p407_p1), %s408_s23 }
  0x4c   : > { %p211_p3 = scmp.gt.s32.totalorder %s410_s24, 0 }
  0x4d   : > { %s663_s23 = smov (!%p204_p2, %s408_s23), 0 }
  0x4e   : > { %s665_s24 = smov (!%p211_p3, %s410_s24), 0  ;;  %s409_s26 = sshll.u32 %s663_s23, 4 }
  0x4f   : > { %s411_s27 = sshll.u32 %s665_s24, 4  ;;  %s207_s28 = scalar_lea.vmem [#allocation2], %s409_s26 }
  0x50   : > { %v208_v3 = vld [vmem:[%s207_s28] sm:$0xff]  ;;  %v209_v4 = vld [vmem:[%s207_s28 + $0x8] sm:$0xff]  ;;  %s214_s29 = scalar_lea.vmem [#allocation2], %s411_s27 }
  0x51   : > { %v431_v5 = vpack.c.bf16 %v209_v4, %v208_v3  ;;  %v215_v6 = vld [vmem:[%s214_s29] sm:$0xff]  ;;  %v216_v7 = vld [vmem:[%s214_s29 + $0x8] sm:$0xff] }
  0x52   : > { %428 = vmatprep.mubr.msk.f32.mxu0 %vm217_vm2, %v215_v6 }
  0x53   : > { %432 = vmatprep.subr.bf16.mxu0 %v431_v5 }
  0x54   : > { %434 = vmatpush3.bf16.msra.mxu0 %v431_v5 }
  0x57   : > { %429 = vmatmul.mubr.msk.f32.vlgmr.msra.gmra.mrb[0].mxu0 %vm217_vm2, %v216_v7 }
 0x12a   : > { %v430_v8 = vpop.f32.mrb[0].mxu0 }
 0x12b   : > { %300 = vst.msk [vmem:[%s214_s29 + $0x8] sm:$0xff] %vm217_vm2, %v430_v8  ;;  %v290_v9 = vpop.f32.mrb[1].mxu0 }
 0x12c   : > { %299 = vst.msk [vmem:[%s214_s29] sm:$0xff] %vm217_vm2, %v290_v9 }
 0x12d PF: > { %p414_p4 = scmp.ne.s32.totalorder %s516_s14, 14 }
 0x12e   : > { %s307_s30 = sld [smem:[#allocation3]] (!%p414_p4)  ;;  %vm315_vm3 = vcmask (!%p414_p4), 130048  }
 0x12f   : > { %306 = sbr.rel (%p414_p4) target bundleno = 316 (0x13c), region = 40 }
 0x134   : > { %s415_s3 = sadd.s32 (!%p414_p4), 4294967295, %s307_s30 }
 0x135   : > { %p309_p5 = scmp.gt.s32.totalorder (!%p414_p4), %s415_s3, 0 }
 0x137   : > { %s667_s3 = smov (!%p309_p5, %s415_s3), 0 }
 0x138   : > { %s416_s4 = sshll.u32 %s667_s3, 4 }
 0x139   : > { %s312_s5 = scalar_lea.vmem [#allocation2], %s416_s4 }
 0x13a   : > { %v313_v10 = vld [vmem:[%s312_s5] sm:$0xff]  ;;  %v314_v11 = vld [vmem:[%s312_s5 + $0x8] sm:$0xff] }
 0x13b   : > { %316 = vst.msk [vmem:[%s595_s25] sm:$0xff] %vm315_vm3, %v313_v10  ;;  %317 = vst.msk [vmem:[%s595_s25 + $0x8] sm:$0xff] %vm315_vm3, %v314_v11 }
 0x13c PF: > { %s18_s17 = sadd.s32 1, %s532_s17   ;;  %s648_s14 = smov %s524_s16 }
 0x13d   : > { %p15_p6 = scmp.ge.s32.totalorder %s18_s17, 32   ;;  %s649_s15 = smov %s528_s0 }
 0x13e   : > { %s650_s16 = smov %s653_s18  ;;  %s651_s0 = smov %s657_s19 }
 0x13f   :  { %17 = sbr.rel (!%p15_p6) target bundleno = 18 (0x12), region = 80 }

// kernel: base_model_forward.5
= control target key start
LH: loop header
LB: loop body
LE: loop exit
PB: predicated region body
PF: predicated region fallthrough
CT: control target
= control target key end

     0   :  { %v387_v7 = vmov 0.0|0.0   ;;  %s566_s0 = inlined_call_operand.vmem [shape: f32[2,256], index: 0, kind: input, shape index: {}]   ;;  %s567_s1 = inlined_call_operand.vmem [shape: f32[256,64], index: 1, kind: input, shape index: {}]   ;;  %s568_s2 = inlined_call_operand.vmem [shape: f32[1,64], index: 2, kind: input, shape index: {}]   ;;  %s569_s3 = inlined_call_operand.vmem [shape: f32[64,4], index: 3, kind: input, shape index: {}]   ;;  %s570_s4 = inlined_call_operand.vmem [shape: f32[1,4], index: 4, kind: input, shape index: {}]   ;;  %s571_s5 = inlined_call_operand.hbm [shape: f32[2,4], index: 5, kind: output, shape index: {}]  }
   0x1   :  { %v38_v0 = vld [vmem:[%s567_s1 + $0x80] sm:$0xff]  ;;  %v39_v1 = vld [vmem:[%s567_s1 + $0x88] sm:$0xff]  ;;  %v40_v5 = vld [vmem:[%s567_s1 + $0x90] sm:$0xff]  ;;  %347 = vmatprep.subr.bf16.mxu1 %v387_v7 }
   0x2   :  { %v22_v2 = vld [vmem:[%s567_s1] sm:$0xff]  ;;  %v315_v3 = vpack.c.bf16 %v39_v1, %v38_v0  ;;  %v23_v4 = vld [vmem:[%s567_s1 + $0x8] sm:$0xff]  ;;  %v41_v6 = vld [vmem:[%s567_s1 + $0x98] sm:$0xff] }
   0x3   :  { %v317_v8 = vpack.c.bf16 %v23_v4, %v22_v2  ;;  %v319_v9 = vpack.c.bf16 %v41_v6, %v40_v5  ;;  %v24_v10 = vld [vmem:[%s567_s1 + $0x10] sm:$0xff]  ;;  %v25_v11 = vld [vmem:[%s567_s1 + $0x18] sm:$0xff]  ;;  %v42_v12 = vld [vmem:[%s567_s1 + $0xa0] sm:$0xff] }
   0x4   :  { %316 = vmatprep.subr.bf16.mxu0 %v315_v3  ;;  %v43_v13 = vld [vmem:[%s567_s1 + $0xa8] sm:$0xff]  ;;  %v321_v14 = vpack.c.bf16 %v25_v11, %v24_v10  ;;  %v26_v16 = vld [vmem:[%s567_s1 + $0x20] sm:$0xff]  ;;  %v44_v18 = vld [vmem:[%s567_s1 + $0xb0] sm:$0xff] }
   0x5   :  { %318 = vmatpush3.bf16.msra.mxu0 %v317_v8  ;;  %v323_v15 = vpack.c.bf16 %v43_v13, %v42_v12  ;;  %v27_v17 = vld [vmem:[%s567_s1 + $0x28] sm:$0xff]  ;;  %v45_v19 = vld [vmem:[%s567_s1 + $0xb8] sm:$0xff]  ;;  %v28_v22 = vld [vmem:[%s567_s1 + $0x30] sm:$0xff] }
   0x6   :  { %320 = vmatprep.subr.bf16.mxu0 %v319_v9  ;;  %v325_v20 = vpack.c.bf16 %v27_v17, %v26_v16  ;;  %v327_v21 = vpack.c.bf16 %v45_v19, %v44_v18  ;;  %v29_v23 = vld [vmem:[%s567_s1 + $0x38] sm:$0xff]  ;;  %v46_v24 = vld [vmem:[%s567_s1 + $0xc0] sm:$0xff]  ;;  %v47_v25 = vld [vmem:[%s567_s1 + $0xc8] sm:$0xff] }
   0x7   :  { %v249_v26 = vld.sshfl [vmem:[%s566_s0] sm:$0x33 pattern:$0x76325410]  ;;  %v144_v29 = vld [vmem:[%s569_s3 + $0x8] sm:$0xff]  ;;  %v145_v30 = vld [vmem:[%s569_s3 + $0x10] sm:$0xff]  ;;  %v329_v31 = vpack.c.bf16 %v29_v23, %v28_v22 }
   0x8   :  { %v69_v27 = vcombine.high %v249_v26, %v249_v26  ;;  %v143_v28 = vld [vmem:[%s569_s3] sm:$0xff]  ;;  %v146_v33 = vld [vmem:[%s569_s3 + $0x18] sm:$0xff] }
   0x9   :  { %322 = vmatpush3.bf16.msra.mxu0 %v321_v14  ;;  %v348_v32 = vpack.c.bf16 %v144_v29, %v143_v28 }
   0xa   :  { %324 = vmatprep.subr.bf16.mxu0 %v323_v15 }
   0xd   :  { %326 = vmatpush3.bf16.msra.mxu0 %v325_v20 }
   0xe   :  { %10 = vsyncpa [#allocation3], 0  ;;  %328 = vmatprep.subr.bf16.mxu0 %v327_v21  ;;  %v331_v34 = vpack.c.bf16 %v47_v25, %v46_v24  ;;  %v30_v35 = vld [vmem:[%s567_s1 + $0x40] sm:$0xff]  ;;  %v31_v36 = vld [vmem:[%s567_s1 + $0x48] sm:$0xff]  ;;  %136 = vmatprep.mubr.f32.mxu0 %v69_v27  ;;  %v351_v39 = vpack.c.bf16 %v146_v33, %v145_v30  ;;  %vm388_vm0 = vmmov 0   ;;  %v389_v63 = vmov 0.0  }
   0xf   :  { %v48_v37 = vld [vmem:[%s567_s1 + $0xd0] sm:$0xff]  ;;  %v49_v38 = vld [vmem:[%s567_s1 + $0xd8] sm:$0xff]  ;;  %349 = vmatpush3.bf16.msra.mxu1 %v348_v32  ;;  %v333_v40 = vpack.c.bf16 %v31_v36, %v30_v35  ;;  %v50_v44 = vld [vmem:[%s567_s1 + $0xe0] sm:$0xff]  ;;  %312 = vmatprep.mubr.msk.f32.mxu1 %vm388_vm0, %v389_v63  ;;  %vm158_vm1 = vcmask 523264   ;;  %vm232_vm2 = vcmask 25600  }
  0x10   :  { %350 = vmatprep.subr.bf16.mxu1 %v387_v7  ;;  %v335_v41 = vpack.c.bf16 %v49_v38, %v48_v37  ;;  %v32_v42 = vld [vmem:[%s567_s1 + $0x50] sm:$0xff]  ;;  %v33_v43 = vld [vmem:[%s567_s1 + $0x58] sm:$0xff]  ;;  %v51_v45 = vld [vmem:[%s567_s1 + $0xe8] sm:$0xff] }
  0x11   :  { %330 = vmatpush3.bf16.msra.mxu0 %v329_v31  ;;  %v337_v46 = vpack.c.bf16 %v33_v43, %v32_v42  ;;  %v339_v47 = vpack.c.bf16 %v51_v45, %v50_v44  ;;  %v34_v48 = vld [vmem:[%s567_s1 + $0x60] sm:$0xff]  ;;  %v35_v49 = vld [vmem:[%s567_s1 + $0x68] sm:$0xff]  ;;  %v52_v50 = vld [vmem:[%s567_s1 + $0xf0] sm:$0xff] }
  0x12   :  { %332 = vmatprep.subr.bf16.mxu0 %v331_v34  ;;  %v53_v51 = vld [vmem:[%s567_s1 + $0xf8] sm:$0xff]  ;;  %v341_v52 = vpack.c.bf16 %v35_v49, %v34_v48  ;;  %v36_v54 = vld [vmem:[%s567_s1 + $0x70] sm:$0xff]  ;;  %v147_v57 = vld [vmem:[%s569_s3 + $0x20] sm:$0xff] }
  0x13   :  { %352 = vmatpush3.bf16.msra.mxu1 %v351_v39  ;;  %v343_v53 = vpack.c.bf16 %v53_v51, %v52_v50  ;;  %v37_v55 = vld [vmem:[%s567_s1 + $0x78] sm:$0xff]  ;;  %v148_v58 = vld [vmem:[%s569_s3 + $0x28] sm:$0xff]  ;;  %v149_v60 = vld [vmem:[%s569_s3 + $0x30] sm:$0xff] }
  0x14   :  { %353 = vmatprep.subr.bf16.mxu1 %v387_v7  ;;  %v345_v56 = vpack.c.bf16 %v37_v55, %v36_v54  ;;  %v354_v59 = vpack.c.bf16 %v148_v58, %v147_v57  ;;  %v150_v61 = vld [vmem:[%s569_s3 + $0x38] sm:$0xff]  ;;  %v248_v1 = vld [vmem:[%s568_s2] ss:$0 sm:$0xff]  ;;  %s390_s3 = smov [#allocation2]  }
  0x15   :  { %334 = vmatpush3.bf16.msra.mxu0 %v333_v40  ;;  %v357_v62 = vpack.c.bf16 %v150_v61, %v149_v60  ;;  %v250_v6 = vld [vmem:[%s570_s4] ss:$0 sm:$0xff]  ;;  %s240_s26 = sshll.u32 %s390_s3, 4  ;;  %s241_s26 = int_to_ptr.vmem [resolvable:$true] %s240_s26 }
  0x16   :  { %336 = vmatprep.subr.bf16.mxu0 %v335_v41  ;;  %s363_s27 = scalar_lea.vmem %s241_s26, 32  ;;  %p368_p1 = scmp.lt.s32.totalorder %s241_s26, %s241_s26 }
  0x17   :  { %355 = vmatpush3.bf16.msra.mxu1 %v354_v59  ;;  %p364_p0 = scmp.ne.s32.totalorder %s241_s26, %s363_s27  ;;  %p369_p2 = scmp.lt.s32.totalorder %s363_s27, %s363_s27 }
  0x18   :  { %356 = vmatprep.subr.bf16.mxu1 %v387_v7 }
  0x19   :  { %338 = vmatpush3.bf16.msra.mxu0 %v337_v46  ;;  %p370_p3 = por %p369_p2, %p368_p1 }
  0x1a   :  { %340 = vmatprep.subr.bf16.mxu0 %v339_v47 }
  0x1b   :  { %358 = vmatpush3.bf16.msra.mxu1 %v357_v62  ;;  %p371_p4 = pnand %p370_p3, %p364_p0 }
  0x1d   :  { %342 = vmatpush3.bf16.msra.mxu0 %v341_v52 }
  0x1e   :  { %344 = vmatprep.subr.bf16.mxu0 %v343_v53 }
  0x21   :  { %346 = vmatpush3.bf16.msra.mxu0 %v345_v56 }
  0x24   :  { %137 = vmatmul.mubr.f32.vlgmr.msra.gmra.mrb[0].mxu0 %v249_v26 }
  0xf7   :  { %v284_v0 = vpop.f32.mrb[0].mxu0 }
  0xf8   :  { %v285_v2 = vpop.f32.mrb[1].mxu0 }
  0xf9   :  { %v286_v3 = vadd.f32 %v285_v2, %v284_v0 }
  0xfb   :  { %v139_v4 = vadd.f32 %v286_v3, %v248_v1 }
  0xfd   :  { %v142_v5 = vmax.f32 %v139_v4, 0.0 }
  0xff   :  { %313 = vmatmul.mubr.msk.f32.vlgmr.msra.gmra.mrb[0].mxu1 %vm158_vm1, %v142_v5 }
 0x1d2   :  { %v228_v7 = vpop.f32.mrb[0].mxu1 }
 0x1d3   :  { %v229_v8 = vadd.f32 %v250_v6, %v228_v7  ;;  %v314_v9 = vpop.f32.mrb[1].mxu1 }
 0x1d5   :  { %233 = vst.msk [vmem:[#allocation2] sm:$0x3] %vm232_vm2, %v229_v8 }
 0x1d6   :  { %374 = shalt.err (!%p371_p4)
}
 0x1d7   :  { %s375_s29 = scalar_lea.hbm %s571_s5, 32 }
 0x1d8   :  { %p376_p5 = scmp.ne.s32.totalorder %s571_s5, %s375_s29  ;;  %p379_p6 = scmp.lt.u32.totalorder %s375_s29, %s571_s5 }
 0x1da   :  { %p381_p7 = pnand %p379_p6, %p376_p5 }
 0x1dc   :  { %384 = shalt.err (!%p381_p7)
}
 0x1dd   :  { %243 = dma.vmem_to_hbm [thread:$0]  %s241_s26, 32, %s571_s5, [#allocation3]  }
 0x1de   :  { %385 = dma.done.wait [#allocation3], 32  }
 0x1df   :  { %386 = vsyncadd [#allocation3], 4294967264 }
 0x1e0   :  { %247 = vsyncpa [#allocation3], 1 }

</bundles_post_ra>
